<compile_context>
chip_gen: v7x
topology: tpu7x:2x2x1
jax: 0.10.0
libtpu: 0.0.40
codegen_flags: <defaults>
</compile_context>

<pallas_src>
from functools import partial

import jax
import jax.numpy as jnp
from jax import lax
from jax.experimental import pallas as pl
from jax.experimental.pallas import tpu as pltpu


def _round_up(x, m):
    return ((x + m - 1) // m) * m


def covariate_forward_kernel(idx_ref,                     # SMEM (n_pad,) int32 (prefetch)
                             pos_m_hbm, pos_v_hbm,        # HBM  (N, K) f32  (pl.ANY)
                             wt_ref, wt2_ref, b_ref,      # VMEM (K, p_pad), (K, p_pad), (1, p_pad)
                             mean_ref, var_ref, proba_ref,  # VMEM out (TN, p_pad)
                             sel_m, sel_v, sem,           # scratch: VMEM (TN,K) x2, DMA sem (2,)
                             *, block_n):
    i = pl.program_id(0)
    base = i * block_n
    n_rows = pos_m_hbm.shape[0]

    # --- Select: gather the rows of this tile from HBM via async DMA (index from SMEM).
    def _start(r, carry):
        row = idx_ref[base + r]
        # Clamp untrusted / padded indices to a valid row (avoids OOB DMA).
        row = jnp.minimum(jnp.maximum(row, 0), n_rows - 1)
        pltpu.make_async_copy(pos_m_hbm.at[pl.ds(row, 1), :],
                              sel_m.at[pl.ds(r, 1), :], sem.at[0]).start()
        pltpu.make_async_copy(pos_v_hbm.at[pl.ds(row, 1), :],
                              sel_v.at[pl.ds(r, 1), :], sem.at[1]).start()
        return carry

    lax.fori_loop(0, block_n, _start, 0)

    # All row copies are in flight; wait for each (descriptors only need matching sizes).
    def _wait(r, carry):
        pltpu.make_async_copy(pos_m_hbm.at[pl.ds(0, 1), :],
                              sel_m.at[pl.ds(0, 1), :], sem.at[0]).wait()
        pltpu.make_async_copy(pos_v_hbm.at[pl.ds(0, 1), :],
                              sel_v.at[pl.ds(0, 1), :], sem.at[1]).wait()
        return carry

    lax.fori_loop(0, block_n, _wait, 0)

    # --- Linear: Gaussian moment propagation (f32 MXU; W^T and (W*W)^T precomputed).
    m = jnp.dot(sel_m[...], wt_ref[...], preferred_element_type=jnp.float32) + b_ref[...]
    v = jnp.dot(sel_v[...], wt2_ref[...], preferred_element_type=jnp.float32)

    # --- Split / GaussianFactor.observed / Logistic.observed forward.
    # The column split into cts/bin heads is done in the wrapper (lane-dense stores here).
    # TODO(synk): exact VMP message updates of f.GaussianFactor / f.Logistic to their
    # observed children (and ELBO terms) are internal-state updates in the reference `f`
    # module; here we emit the predictive moments / logistic-normal probabilities.
    mean_ref[...] = m
    var_ref[...] = v
    proba_ref[...] = jax.nn.sigmoid(m * lax.rsqrt(1.0 + (jnp.pi / 8.0) * v))


def covariate_forward(positions_mean, positions_var, index, weight, bias, p_cts,
                      block_n=None):
    """Wrapper: pad to lane/sublane-friendly shapes, run the tiled kernel, split heads."""
    N, K = positions_mean.shape
    n = index.shape[0]
    p = weight.shape[0]
    p_bin = p - p_cts

    LANE = 128
    p_pad = _round_up(p, LANE)
    if block_n is None:
        block_n = min(256, _round_up(n, 8))
    block_n = _round_up(block_n, 8)
    n_pad = _round_up(n, block_n)
    grid = (n_pad // block_n,)

    # Layout plumbing (done once by XLA, outside the kernel).
    idx = jnp.pad(index.astype(jnp.int32), (0, n_pad - n))          # pad rows -> row 0
    wt = jnp.pad(weight.T.astype(jnp.float32), ((0, 0), (0, p_pad - p)))   # (K, p_pad)
    wt2 = wt * wt                                                    # precomputed W∘W
    b2d = jnp.pad(bias.astype(jnp.float32).reshape(1, p), ((0, 0), (0, p_pad - p)))

    out_shape = tuple(jax.ShapeDtypeStruct((n_pad, p_pad), jnp.float32) for _ in range(3))

    grid_spec = pltpu.PrefetchScalarGridSpec(
        num_scalar_prefetch=1,
        grid=grid,
        in_specs=[
            pl.BlockSpec(memory_space=pl.ANY),                    # positions_mean (HBM)
            pl.BlockSpec(memory_space=pl.ANY),                    # positions_var  (HBM)
            pl.BlockSpec((K, p_pad), lambda i, idx: (0, 0)),      # W^T   (resident)
            pl.BlockSpec((K, p_pad), lambda i, idx: (0, 0)),      # (W*W)^T (resident)
            pl.BlockSpec((1, p_pad), lambda i, idx: (0, 0)),      # bias  (resident)
        ],
        out_specs=(
            pl.BlockSpec((block_n, p_pad), lambda i, idx: (i, 0)),
            pl.BlockSpec((block_n, p_pad), lambda i, idx: (i, 0)),
            pl.BlockSpec((block_n, p_pad), lambda i, idx: (i, 0)),
        ),
        scratch_shapes=[
            pltpu.VMEM((block_n, K), jnp.float32),   # gathered position means
            pltpu.VMEM((block_n, K), jnp.float32),   # gathered position variances
            pltpu.SemaphoreType.DMA((2,)),
        ],
    )

    mean, var, proba = pl.pallas_call(
        partial(covariate_forward_kernel, block_n=block_n),
        out_shape=out_shape,
        grid_spec=grid_spec,
        compiler_params=pltpu.CompilerParams(
            dimension_semantics=("parallel",)),
    )(idx,
      positions_mean.astype(jnp.float32), positions_var.astype(jnp.float32),
      wt, wt2, b2d)

    # Split into continuous / binary heads + strip padding (wrapper-side, lane-dense kernel).
    mean_cts = mean[:n, :p_cts]
    var_cts = var[:n, :p_cts]
    mean_bin = mean[:n, p_cts:p]
    var_bin = var[:n, p_cts:p]
    proba_bin = proba[:n, p_cts:p]
    return mean_cts, var_cts, mean_bin, var_bin, proba_bin


def covariate_forward_ref(positions_mean, positions_var, index, weight, bias, p_cts):
    sel_m = positions_mean[index]
    sel_v = positions_var[index]
    mean = sel_m @ weight.T + bias[None, :]
    var = sel_v @ (weight * weight).T
    mean_cts, mean_bin = mean[:, :p_cts], mean[:, p_cts:]
    var_cts, var_bin = var[:, :p_cts], var[:, p_cts:]
    proba_bin = jax.nn.sigmoid(mean_bin / jnp.sqrt(1.0 + (jnp.pi / 8.0) * var_bin))
    return mean_cts, var_cts, mean_bin, var_bin, proba_bin


if __name__ == "__main__":
    # Small shapes consistent with the module's __init__.
    N_total, K = 16, 32          # positions: (N_total, K) Gaussian
    n = 8                        # index.shape[0]
    p_cts, p_bin = 4, 4
    p = p_cts + p_bin

    key = jax.random.PRNGKey(0)
    k_pm, k_pv, k_idx, k_w, k_b, k_xc, k_xb = jax.random.split(key, 7)

    positions_mean = jax.random.normal(k_pm, (N_total, K), dtype=jnp.float32)
    positions_var = 0.1 + jax.random.uniform(k_pv, (N_total, K), dtype=jnp.float32)
    index = jax.random.randint(k_idx, (n,), 0, N_total, dtype=jnp.int32)
    weight = 0.1 * jax.random.normal(k_w, (p, K), dtype=jnp.float32)
    bias = 0.1 * jax.random.normal(k_b, (p,), dtype=jnp.float32)
    # Observed covariates (consumed by the observed factors; not needed for forward math).
    X_cts = jax.random.normal(k_xc, (n, p_cts), dtype=jnp.float32)
    X_bin = (jax.random.uniform(k_xb, (n, p_bin)) > 0.5).astype(jnp.float32)

    outs = covariate_forward(positions_mean, positions_var, index, weight, bias, p_cts)
    outs = jax.block_until_ready(outs)

    refs = covariate_forward_ref(positions_mean, positions_var, index, weight, bias, p_cts)
    for o, r in zip(outs, refs):
        assert o.shape == r.shape and o.dtype == r.dtype
        assert jnp.allclose(o, r, atol=1e-5, rtol=1e-5), "mismatch vs pure-JAX reference"

    print("KERNEL_OK")
</pallas_src>

<mosaic_0001>
module attributes {stable_mosaic.version = 11 : i64} {
  func.func @covariate_forward_kernel(%arg0: i32, %arg1: memref<8xi32, #tpu.memory_space<smem>>, %arg2: memref<16x32xf32, #tpu.memory_space<any>>, %arg3: memref<16x32xf32, #tpu.memory_space<any>>, %arg4: memref<32x128xf32, #tpu.memory_space<vmem>>, %arg5: memref<32x128xf32, #tpu.memory_space<vmem>>, %arg6: memref<1x128xf32, #tpu.memory_space<vmem>>, %arg7: memref<8x128xf32, #tpu.memory_space<vmem>>, %arg8: memref<8x128xf32, #tpu.memory_space<vmem>>, %arg9: memref<8x128xf32, #tpu.memory_space<vmem>>, %arg10: memref<8x32xf32, #tpu.memory_space<vmem>>, %arg11: memref<8x32xf32, #tpu.memory_space<vmem>>, %arg12: memref<2x!tpu.dma_semaphore, #tpu.memory_space<semaphore_mem>>) attributes {dimension_semantics = [#tpu.dimension_semantics<parallel>], iteration_bounds = array<i64: 1>, scalar_prefetch = 1 : i64, scratch_operands = 3 : i64, tpu.core_type = #tpu.core_type<tc>, window_params = [{}, {}, {pipeline_mode = #tpu.pipeline_mode<synchronous>, transform_indices = @transform_2, window_bounds = array<i64: 32, 128>}, {pipeline_mode = #tpu.pipeline_mode<synchronous>, transform_indices = @transform_3, window_bounds = array<i64: 32, 128>}, {pipeline_mode = #tpu.pipeline_mode<synchronous>, transform_indices = @transform_4, window_bounds = array<i64: 1, 128>}, {transform_indices = @transform_5, window_bounds = array<i64: 8, 128>}, {transform_indices = @transform_6, window_bounds = array<i64: 8, 128>}, {transform_indices = @transform_7, window_bounds = array<i64: 8, 128>}]} {
    %c8_i32 = arith.constant 8 : i32
    %0 = arith.muli %arg0, %c8_i32 : i32
    %c0_i32 = arith.constant 0 : i32
    %c8_i32_0 = arith.constant 8 : i32
    %1 = arith.addi %c0_i32, %c8_i32_0 : i32
    %c1_i32 = arith.constant 1 : i32
    scf.for %arg13 = %c0_i32 to %1 step %c1_i32  : i32 {
      %26 = arith.addi %0, %arg13 : i32
      %27 = arith.index_cast %26 : i32 to index
      %28 = memref.load %arg1[%27] : memref<8xi32, #tpu.memory_space<smem>>
      %c0_i32_24 = arith.constant 0 : i32
      %29 = arith.maxsi %28, %c0_i32_24 : i32
      %c15_i32 = arith.constant 15 : i32
      %30 = arith.minsi %29, %c15_i32 : i32
      %c0_i32_25 = arith.constant 0 : i32
      %c0_i32_26 = arith.constant 0 : i32
      %31 = tpu.memref_slice %arg2[%30, %c0_i32_26] : memref<16x32xf32, #tpu.memory_space<any>> -> memref<1x32xf32, #tpu.memory_space<any>>
      %c0_i32_27 = arith.constant 0 : i32
      %32 = tpu.memref_slice %arg10[%arg13, %c0_i32_27] : memref<8x32xf32, #tpu.memory_space<vmem>> -> memref<1x32xf32, #tpu.memory_space<vmem>>
      %33 = tpu.memref_slice %arg12[%c0_i32_25] : memref<2x!tpu.dma_semaphore, #tpu.memory_space<semaphore_mem>> -> memref<1x!tpu.dma_semaphore, #tpu.memory_space<semaphore_mem>>
      %34 = tpu.memref_squeeze %33 : memref<1x!tpu.dma_semaphore, #tpu.memory_space<semaphore_mem>> -> memref<!tpu.dma_semaphore, #tpu.memory_space<semaphore_mem>>
      tpu.enqueue_dma source(%31 : memref<1x32xf32, #tpu.memory_space<any>>) target(%32 : memref<1x32xf32, #tpu.memory_space<vmem>>) target_semaphore(%34 : memref<!tpu.dma_semaphore, #tpu.memory_space<semaphore_mem>>)
      %c1_i32_28 = arith.constant 1 : i32
      %c0_i32_29 = arith.constant 0 : i32
      %35 = tpu.memref_slice %arg3[%30, %c0_i32_29] : memref<16x32xf32, #tpu.memory_space<any>> -> memref<1x32xf32, #tpu.memory_space<any>>
      %c0_i32_30 = arith.constant 0 : i32
      %36 = tpu.memref_slice %arg11[%arg13, %c0_i32_30] : memref<8x32xf32, #tpu.memory_space<vmem>> -> memref<1x32xf32, #tpu.memory_space<vmem>>
      %37 = tpu.memref_slice %arg12[%c1_i32_28] : memref<2x!tpu.dma_semaphore, #tpu.memory_space<semaphore_mem>> -> memref<1x!tpu.dma_semaphore, #tpu.memory_space<semaphore_mem>>
      %38 = tpu.memref_squeeze %37 : memref<1x!tpu.dma_semaphore, #tpu.memory_space<semaphore_mem>> -> memref<!tpu.dma_semaphore, #tpu.memory_space<semaphore_mem>>
      tpu.enqueue_dma source(%35 : memref<1x32xf32, #tpu.memory_space<any>>) target(%36 : memref<1x32xf32, #tpu.memory_space<vmem>>) target_semaphore(%38 : memref<!tpu.dma_semaphore, #tpu.memory_space<semaphore_mem>>)
    }
    %c8_i32_1 = arith.constant 8 : i32
    %c0_i32_2 = arith.constant 0 : i32
    %c8_i32_3 = arith.constant 8 : i32
    %2 = arith.addi %c0_i32_2, %c8_i32_3 : i32
    %c1_i32_4 = arith.constant 1 : i32
    scf.for %arg13 = %c0_i32_2 to %2 step %c1_i32_4  : i32 {
      %c0_i32_24 = arith.constant 0 : i32
      %c0_i32_25 = arith.constant 0 : i32
      %c0_i32_26 = arith.constant 0 : i32
      %26 = tpu.memref_slice %arg2[%c0_i32_25, %c0_i32_26] : memref<16x32xf32, #tpu.memory_space<any>> -> memref<1x32xf32, #tpu.memory_space<any>>
      %c0_i32_27 = arith.constant 0 : i32
      %c0_i32_28 = arith.constant 0 : i32
      %27 = tpu.memref_slice %arg10[%c0_i32_27, %c0_i32_28] : memref<8x32xf32, #tpu.memory_space<vmem>> -> memref<1x32xf32, #tpu.memory_space<vmem>>
      %28 = tpu.memref_slice %arg12[%c0_i32_24] : memref<2x!tpu.dma_semaphore, #tpu.memory_space<semaphore_mem>> -> memref<1x!tpu.dma_semaphore, #tpu.memory_space<semaphore_mem>>
      %29 = tpu.memref_squeeze %28 : memref<1x!tpu.dma_semaphore, #tpu.memory_space<semaphore_mem>> -> memref<!tpu.dma_semaphore, #tpu.memory_space<semaphore_mem>>
      tpu.wait_dma2 semaphore(%29 : memref<!tpu.dma_semaphore, #tpu.memory_space<semaphore_mem>>) src(%26 : memref<1x32xf32, #tpu.memory_space<any>>) dst(%27 : memref<1x32xf32, #tpu.memory_space<vmem>>)
      %c1_i32_29 = arith.constant 1 : i32
      %c0_i32_30 = arith.constant 0 : i32
      %c0_i32_31 = arith.constant 0 : i32
      %30 = tpu.memref_slice %arg3[%c0_i32_30, %c0_i32_31] : memref<16x32xf32, #tpu.memory_space<any>> -> memref<1x32xf32, #tpu.memory_space<any>>
      %c0_i32_32 = arith.constant 0 : i32
      %c0_i32_33 = arith.constant 0 : i32
      %31 = tpu.memref_slice %arg11[%c0_i32_32, %c0_i32_33] : memref<8x32xf32, #tpu.memory_space<vmem>> -> memref<1x32xf32, #tpu.memory_space<vmem>>
      %32 = tpu.memref_slice %arg12[%c1_i32_29] : memref<2x!tpu.dma_semaphore, #tpu.memory_space<semaphore_mem>> -> memref<1x!tpu.dma_semaphore, #tpu.memory_space<semaphore_mem>>
      %33 = tpu.memref_squeeze %32 : memref<1x!tpu.dma_semaphore, #tpu.memory_space<semaphore_mem>> -> memref<!tpu.dma_semaphore, #tpu.memory_space<semaphore_mem>>
      tpu.wait_dma2 semaphore(%33 : memref<!tpu.dma_semaphore, #tpu.memory_space<semaphore_mem>>) src(%30 : memref<1x32xf32, #tpu.memory_space<any>>) dst(%31 : memref<1x32xf32, #tpu.memory_space<vmem>>)
    }
    %c0 = arith.constant 0 : index
    %c0_5 = arith.constant 0 : index
    %3 = vector.load %arg10[%c0, %c0_5] : memref<8x32xf32, #tpu.memory_space<vmem>>, vector<8x32xf32>
    %c0_6 = arith.constant 0 : index
    %c0_7 = arith.constant 0 : index
    %4 = vector.load %arg4[%c0_6, %c0_7] : memref<32x128xf32, #tpu.memory_space<vmem>>, vector<32x128xf32>
    %cst = arith.constant dense<0.000000e+00> : vector<8x128xf32>
    %5 = tpu.matmul %3, %4, %cst {dimension_numbers = #tpu.dot_dimension_numbers<[1], [0], [0], [1], [0, 0, 1, 1], [], []>} : vector<8x32xf32>, vector<32x128xf32>, vector<8x128xf32> -> vector<8x128xf32>
    %c0_8 = arith.constant 0 : index
    %c0_9 = arith.constant 0 : index
    %6 = vector.load %arg6[%c0_8, %c0_9] : memref<1x128xf32, #tpu.memory_space<vmem>>, vector<1x128xf32>
    %7 = vector.broadcast %6 : vector<1x128xf32> to vector<8x128xf32>
    %8 = arith.addf %5, %7 : vector<8x128xf32>
    %c0_10 = arith.constant 0 : index
    %c0_11 = arith.constant 0 : index
    %9 = vector.load %arg11[%c0_10, %c0_11] : memref<8x32xf32, #tpu.memory_space<vmem>>, vector<8x32xf32>
    %c0_12 = arith.constant 0 : index
    %c0_13 = arith.constant 0 : index
    %10 = vector.load %arg5[%c0_12, %c0_13] : memref<32x128xf32, #tpu.memory_space<vmem>>, vector<32x128xf32>
    %cst_14 = arith.constant dense<0.000000e+00> : vector<8x128xf32>
    %11 = tpu.matmul %9, %10, %cst_14 {dimension_numbers = #tpu.dot_dimension_numbers<[1], [0], [0], [1], [0, 0, 1, 1], [], []>} : vector<8x32xf32>, vector<32x128xf32>, vector<8x128xf32> -> vector<8x128xf32>
    %c0_15 = arith.constant 0 : index
    %c0_16 = arith.constant 0 : index
    %12 = vector.load %arg7[%c0_15, %c0_16] : memref<8x128xf32, #tpu.memory_space<vmem>>, vector<8x128xf32>
    tpu.vector_store %arg7[%c0_15, %c0_16], %8 {strides = array<i32>} : memref<8x128xf32, #tpu.memory_space<vmem>>, vector<8x128xf32>,
    %c0_17 = arith.constant 0 : index
    %c0_18 = arith.constant 0 : index
    %13 = vector.load %arg8[%c0_17, %c0_18] : memref<8x128xf32, #tpu.memory_space<vmem>>, vector<8x128xf32>
    tpu.vector_store %arg8[%c0_17, %c0_18], %11 {strides = array<i32>} : memref<8x128xf32, #tpu.memory_space<vmem>>, vector<8x128xf32>,
    %cst_19 = arith.constant 0.392699093 : f32
    %14 = vector.broadcast %cst_19 : f32 to vector<8x128xf32>
    %15 = arith.mulf %14, %11 : vector<8x128xf32>
    %cst_20 = arith.constant 1.000000e+00 : f32
    %16 = vector.broadcast %cst_20 : f32 to vector<8x128xf32>
    %17 = arith.addf %16, %15 : vector<8x128xf32>
    %18 = math.rsqrt %17 : vector<8x128xf32>
    %19 = arith.mulf %8, %18 : vector<8x128xf32>
    %20 = arith.negf %19 : vector<8x128xf32>
    %21 = math.exp %20 : vector<8x128xf32>
    %cst_21 = arith.constant 1.000000e+00 : f32
    %22 = vector.broadcast %cst_21 : f32 to vector<8x128xf32>
    %23 = arith.addf %22, %21 : vector<8x128xf32>
    %24 = arith.divf %22, %23 : vector<8x128xf32>
    %c0_22 = arith.constant 0 : index
    %c0_23 = arith.constant 0 : index
    %25 = vector.load %arg9[%c0_22, %c0_23] : memref<8x128xf32, #tpu.memory_space<vmem>>, vector<8x128xf32>
    tpu.vector_store %arg9[%c0_22, %c0_23], %24 {strides = array<i32>} : memref<8x128xf32, #tpu.memory_space<vmem>>, vector<8x128xf32>,
    return
  }
  func.func @transform_2(%arg0: i32, %arg1: memref<8xi32, #tpu.memory_space<smem>>) -> (i32, i32) {
    %c0_i32 = arith.constant 0 : i32
    %c0_i32_0 = arith.constant 0 : i32
    %c0_i32_1 = arith.constant 0 : i32
    return %c0_i32, %c0_i32_0 : i32, i32
  }
  func.func @transform_3(%arg0: i32, %arg1: memref<8xi32, #tpu.memory_space<smem>>) -> (i32, i32) {
    %c0_i32 = arith.constant 0 : i32
    %c0_i32_0 = arith.constant 0 : i32
    %c0_i32_1 = arith.constant 0 : i32
    return %c0_i32, %c0_i32_0 : i32, i32
  }
  func.func @transform_4(%arg0: i32, %arg1: memref<8xi32, #tpu.memory_space<smem>>) -> (i32, i32) {
    %c0_i32 = arith.constant 0 : i32
    %c0_i32_0 = arith.constant 0 : i32
    %c0_i32_1 = arith.constant 0 : i32
    return %c0_i32, %c0_i32_0 : i32, i32
  }
  func.func @transform_5(%arg0: i32, %arg1: memref<8xi32, #tpu.memory_space<smem>>) -> (i32, i32) {
    %c0_i32 = arith.constant 0 : i32
    %c0_i32_0 = arith.constant 0 : i32
    return %arg0, %c0_i32 : i32, i32
  }
  func.func @transform_6(%arg0: i32, %arg1: memref<8xi32, #tpu.memory_space<smem>>) -> (i32, i32) {
    %c0_i32 = arith.constant 0 : i32
    %c0_i32_0 = arith.constant 0 : i32
    return %arg0, %c0_i32 : i32, i32
  }
  func.func @transform_7(%arg0: i32, %arg1: memref<8xi32, #tpu.memory_space<smem>>) -> (i32, i32) {
    %c0_i32 = arith.constant 0 : i32
    %c0_i32_0 = arith.constant 0 : i32
    return %arg0, %c0_i32 : i32, i32
  }
}

</mosaic_0001>

<bundles_post_ra>
// kernel: tpu_custom_call.1
= control target key start
LH: loop header
LB: loop body
LE: loop exit
PB: predicated region body
PF: predicated region fallthrough
CT: control target
= control target key end

     0   :  { %s822_s0 = inlined_call_operand.hbm [shape: s32[8], index: 0, kind: input, shape index: {}]   ;;  %s823_s1 = inlined_call_operand.hbm [shape: f32[16,32], index: 1, kind: input, shape index: {}]   ;;  %s824_s2 = inlined_call_operand.hbm [shape: f32[16,32], index: 2, kind: input, shape index: {}]   ;;  %s825_s3 = inlined_call_operand.hbm [shape: f32[32,128], index: 3, kind: input, shape index: {}]   ;;  %s826_s4 = inlined_call_operand.hbm [shape: f32[32,128], index: 4, kind: input, shape index: {}]   ;;  %s827_s5 = inlined_call_operand.vmem [shape: f32[1,128], index: 5, kind: input, shape index: {}]   ;;  %s828_s6 = inlined_call_operand.hbm [shape: f32[8,128], index: 6, kind: output, shape index: {0}]   ;;  %s829_s7 = inlined_call_operand.hbm [shape: f32[8,128], index: 7, kind: output, shape index: {1}]   ;;  %s830_s8 = inlined_call_operand.hbm [shape: f32[8,128], index: 8, kind: output, shape index: {2}]  }
   0x1   :  { %s449_s29 = scalar_lea.hbm %s822_s0, 16 }
   0x2   :  { %p450_p0 = scmp.ne.s32.totalorder %s822_s0, %s449_s29  ;;  %p453_p1 = scmp.lt.u32.totalorder %s449_s29, %s822_s0 }
   0x4   :  { %p455_p2 = pnand %p453_p1, %p450_p0 }
   0x6   :  { %458 = shalt.err (!%p455_p2)  }
   0x7   :  { %s647_s12 = smov [#allocation6]  }
   0x8   :  { %15 = dma.hbm_to_smem %s822_s0, 16, %s647_s12, [#allocation5] }
   0x9   :  { %625 = dma.done.wait [#allocation5], 16 }
   0xa   :  { %626 = vsyncadd [#allocation5], 4294967280 }
   0xb   :  { %17 = sfence }
   0xc   :  { %18 = vsyncpa [#allocation8], 0 }
   0xd   :  { %19 = vsyncpa [#allocation11], 0 }
   0xe   :  { %20 = vsyncpa [#allocation9], 0 }
   0xf   :  { %21 = vsyncpa [#allocation14], 0  ;;  %s648_s15 = smov [#allocation7]   ;;  %s459_s19 = scalar_lea.hbm %s825_s3, 512 }
  0x10   :  { %s27_s16 = sshll.u32 %s648_s15, 4  ;;  %p460_p3 = scmp.ne.s32.totalorder %s825_s3, %s459_s19  ;;  %s28_s16 = int_to_ptr.vmem [resolvable:$true] %s27_s16 }
  0x11   :  { %p463_p4 = scmp.lt.u32.totalorder %s459_s19, %s825_s3 }
  0x13   :  { %p465_p5 = pnand %p463_p4, %p460_p3 }
  0x15   :  { %468 = shalt.err (!%p465_p5)
}
  0x16   :  { %s469_s23 = scalar_lea.vmem %s28_s16, 512  ;;  %p474_p7 = scmp.lt.s32.totalorder %s28_s16, %s28_s16 }
  0x17   :  { %p470_p6 = scmp.ne.s32.totalorder %s28_s16, %s469_s23  ;;  %p475_p8 = scmp.lt.s32.totalorder %s469_s23, %s469_s23 }
  0x19   :  { %p476_p9 = por %p475_p8, %p474_p7 }
  0x1b   :  { %p477_p10 = pnand %p476_p9, %p470_p6 }
  0x1d   :  { %480 = shalt.err (!%p477_p10)
}
  0x1e   :  { %s649_s24 = smov 128   ;;  %s650_s25 = smov 8  }
  0x1f   :  { %33 = dma.hbm_to_vmem [thread:$0]  %s825_s3, 512, %s28_s16, [#allocation8], %s649_s24, %s649_s24, %s650_s25  }
  0x20   :  { %s651_s28 = smov [#allocation10]   ;;  %s481_s10 = scalar_lea.hbm %s826_s4, 512 }
  0x21   :  { %s39_s29 = sshll.u32 %s651_s28, 4  ;;  %p482_p11 = scmp.ne.s32.totalorder %s826_s4, %s481_s10  ;;  %s40_s29 = int_to_ptr.vmem [resolvable:$true] %s39_s29 }
  0x22   :  { %p485_p12 = scmp.lt.u32.totalorder %s481_s10, %s826_s4 }
  0x24   :  { %p487_p13 = pnand %p485_p12, %p482_p11 }
  0x26   :  { %490 = shalt.err (!%p487_p13)
}
  0x27   :  { %s491_s15 = scalar_lea.vmem %s40_s29, 512  ;;  %p496_p1 = scmp.lt.s32.totalorder %s40_s29, %s40_s29 }
  0x28   :  { %p492_p0 = scmp.ne.s32.totalorder %s40_s29, %s491_s15  ;;  %p497_p2 = scmp.lt.s32.totalorder %s491_s15, %s491_s15 }
  0x2a   :  { %p498_p3 = por %p497_p2, %p496_p1 }
  0x2c   :  { %p499_p4 = pnand %p498_p3, %p492_p0 }
  0x2e   :  { %502 = shalt.err (!%p499_p4)
}
  0x2f   :  { %45 = dma.hbm_to_vmem [thread:$0]  %s826_s4, 512, %s40_s29, [#allocation11], %s649_s24, %s649_s24, %s650_s25  }
  0x30   :  { %627 = dma.done.wait [#allocation8], 512  }
  0x31   :  { %628 = vsyncadd [#allocation8], 4294966784 }
  0x32   :  { %629 = dma.done.wait [#allocation11], 512  }
  0x33   :  { %630 = vsyncadd [#allocation11], 4294966784  ;;  %s741_s17 = smov 0  }
  0x34 LB: > { %s62_s18 = sld [smem:[#allocation6 + %s641_s17]]  ;;  %s69_s19 = scalar_lea.vmem [#allocation2], %s641_s17  ;;  %s641_s17 = sphi %s741_s17, %s60_s17  }
  0x35   : > { %s77_s20 = sshll.u32 %s69_s19, 4  ;;  %s83_s4 = scalar_lea.vmem [#allocation3], %s641_s17  ;;  %s78_s20 = int_to_ptr.vmem [resolvable:$true] %s77_s20 }
  0x36   : > { %s92_s21 = sshll.u32 %s83_s4, 4  ;;  %s505_s9 = scalar_lea.hbm %s823_s1, 256  ;;  %s749_s21 = int_to_ptr.vmem [resolvable:$true] %s92_s21 }
  0x3a   : > { %p63_p5 = scmp.gt.s32.totalorder %s62_s18, 0  ;;  %p357_p6 = scmp.lt.s32.totalorder %s62_s18, 15 }
  0x3c   : > { %s832_s18 = smov (!%p63_p5, %s62_s18), 0 }
  0x3d   : > { %s834_s18 = smov (!%p357_p6, %s832_s18), 15 }
  0x3e   : > { %s362_s22 = sshll.u32 %s834_s18, 4 }
  0x3f   : > { %s68_s24 = scalar_lea.hbm %s823_s1, %s362_s22  ;;  %s757_s27 = scalar_lea.hbm %s824_s2, %s362_s22 }
  0x40   : > { %s503_s28 = scalar_lea.hbm %s68_s24, 16  ;;  %p506_p8 = scmp.lt.u32.totalorder %s68_s24, %s823_s1 }
  0x41   : > { %p504_p7 = scmp.ne.s32.totalorder %s68_s24, %s503_s28  ;;  %p507_p9 = scmp.lt.u32.totalorder %s505_s9, %s503_s28 }
  0x42   : > { %p509_p11 = scmp.lt.u32.totalorder %s503_s28, %s68_s24 }
  0x43   : > { %p508_p10 = por %p507_p9, %p506_p8 }
  0x45   : > { %p510_p12 = por %p509_p11, %p508_p10 }
  0x47   : > { %p511_p13 = pnand %p510_p12, %p504_p7 }
  0x49   : > { %514 = shalt.err (!%p511_p13)  }
  0x4a   : > { %s515_s12 = scalar_lea.vmem %s78_s20, 16  ;;  %s652_s13 = smov [#allocation2]  }
  0x4b   : > { %p516_p0 = scmp.ne.s32.totalorder %s78_s20, %s515_s12  ;;  %s517_s14 = sshll.u32 %s652_s13, 4  ;;  %s518_s14 = int_to_ptr.vmem [resolvable:$false] %s517_s14 }
  0x4c   : > { %s519_s15 = scalar_lea.vmem %s518_s14, 128  ;;  %p520_p1 = scmp.lt.s32.totalorder %s78_s20, %s518_s14 }
  0x4d   : > { %p521_p2 = scmp.lt.s32.totalorder %s519_s15, %s515_s12 }
  0x4f   : > { %p522_p3 = por %p521_p2, %p520_p1 }
  0x51   : > { %p523_p4 = pnand %p522_p3, %p516_p0 }
  0x53   : > { %526 = shalt.err (!%p523_p4)  }
  0x54   : > { %80 = dma.hbm_to_vmem [thread:$0]  %s68_s24, 16, %s78_s20, [#allocation4] }
  0x55   : > { %s527_s3 = scalar_lea.hbm %s757_s27, 16  ;;  %s529_s19 = scalar_lea.hbm %s824_s2, 256 }
  0x56   : > { %p528_p5 = scmp.ne.s32.totalorder %s757_s27, %s527_s3  ;;  %p530_p6 = scmp.lt.u32.totalorder %s757_s27, %s824_s2 }
  0x57   : > { %p531_p7 = scmp.lt.u32.totalorder %s529_s19, %s527_s3  ;;  %p533_p9 = scmp.lt.u32.totalorder %s527_s3, %s757_s27 }
  0x59   : > { %p532_p8 = por %p531_p7, %p530_p6 }
  0x5b   : > { %p534_p10 = por %p533_p9, %p532_p8 }
  0x5d   : > { %p535_p11 = pnand %p534_p10, %p528_p5 }
  0x5f   : > { %538 = shalt.err (!%p535_p11)  }
  0x60   : > { %s539_s20 = scalar_lea.vmem %s749_s21, 16  ;;  %s653_s0 = smov [#allocation3]  }
  0x61   : > { %p540_p12 = scmp.ne.s32.totalorder %s749_s21, %s539_s20  ;;  %s541_s23 = sshll.u32 %s653_s0, 4  ;;  %s542_s23 = int_to_ptr.vmem [resolvable:$false] %s541_s23 }
  0x62   : > { %s543_s24 = scalar_lea.vmem %s542_s23, 128  ;;  %p544_p13 = scmp.lt.s32.totalorder %s749_s21, %s542_s23 }
  0x63   : > { %p545_p0 = scmp.lt.s32.totalorder %s543_s24, %s539_s20 }
  0x65   : > { %p546_p1 = por %p545_p0, %p544_p13 }
  0x67   : > { %p547_p2 = pnand %p546_p1, %p540_p12 }
  0x69   : > { %550 = shalt.err (!%p547_p2)  }
  0x6a   : > { %95 = dma.hbm_to_vmem [thread:$0]  %s757_s27, 16, %s749_s21, [#allocation4 + $0x1] }
  0x6b   : > { %s60_s17 = sadd.s32 1, %s641_s17  }
  0x6c   : > { %p57_p3 = scmp.ge.s32.totalorder %s60_s17, 8  }
  0x6d   :  { %s643_s25 = smov (%p57_p3), 0  }
  0x6e   :  { %59 = sbr.rel (!%p57_p3) target bundleno = 52 (0x34), region = 85 }
  0x75 LB: > { %631 = dma.done.wait [#allocation4], 16  ;;  %s645_s25 = sphi %s643_s25, %s101_s25  }
  0x76   : > { %632 = vsyncadd [#allocation4], 4294967280 }
  0x77   : > { %633 = dma.done.wait [#allocation4 + $0x1], 16 }
  0x78   : > { %634 = vsyncadd [#allocation4 + $0x1], 4294967280  ;;  %s101_s25 = sadd.s32 1, %s645_s25  }
  0x79   : > { %p98_p4 = scmp.ge.s32.totalorder %s101_s25, 8  }
  0x7a   :  { %v195_v0 = vld [vmem:[#allocation10] sm:$0xff] (%p98_p4)  ;;  %v196_v1 = vld [vmem:[#allocation10 + $0x8] sm:$0xff] (%p98_p4)  ;;  %v197_v2 = vld [vmem:[#allocation10 + $0x10] sm:$0xff] (%p98_p4)  ;;  %v654_v3 = vmov (%p98_p4), 0.0|0.0   ;;  %vm655_vm0 = vmmov (%p98_p4), 0   ;;  %v656_v6 = vmov (%p98_p4), 0.0  }
  0x7b   :  { %100 = sbr.rel (!%p98_p4) target bundleno = 117 (0x75), region = 96  ;;  %410 = vmatprep.subr.bf16.mxu1 (%p98_p4), %v654_v3  ;;  %v411_v4 = vpack.c.bf16 (%p98_p4), %v196_v1, %v195_v0  ;;  %v198_v5 = vld [vmem:[#allocation10 + $0x18] sm:$0xff] (%p98_p4)  ;;  %401 = vmatprep.mubr.msk.f32.mxu1 (%p98_p4), %vm655_vm0, %v656_v6  ;;  %v109_v7 = vld [vmem:[#allocation7] sm:$0xff] (%p98_p4)  ;;  %v110_v8 = vld [vmem:[#allocation7 + $0x8] sm:$0xff] (%p98_p4)  ;;  %vm120_vm1 = vcmask (%p98_p4), 261120   ;;  %s657_s1 = smov (%p98_p4), [#allocation13]  }
  0x7c   :  { %404 = vmatprep.subr.bf16.mxu0 (%p98_p4), %v654_v3  ;;  %v111_v9 = vld [vmem:[#allocation7 + $0x10] sm:$0xff] (%p98_p4)  ;;  %v112_v10 = vld [vmem:[#allocation7 + $0x18] sm:$0xff] (%p98_p4)  ;;  %390 = vmatprep.mubr.msk.f32.mxu0 (%p98_p4), %vm655_vm0, %v656_v6  ;;  %v414_v11 = vpack.c.bf16 (%p98_p4), %v198_v5, %v197_v2  ;;  %v405_v12 = vpack.c.bf16 (%p98_p4), %v110_v8, %v109_v7  ;;  %s301_s2 = sshll.u32 (%p98_p4), %s657_s1, 4  ;;  %s658_s26 = smov (%p98_p4), [#allocation12]   ;;  %s302_s2 = int_to_ptr.vmem [resolvable:$true] %s301_s2 }
  0x7d   :  { %412 = vmatpush3.bf16.msra.mxu1 (%p98_p4), %v411_v4  ;;  %v408_v13 = vpack.c.bf16 (%p98_p4), %v112_v10, %v111_v9  ;;  %v194_v14 = vld [vmem:[#allocation3] sm:$0xff] (%p98_p4)  ;;  %v108_v15 = vld [vmem:[#allocation2] sm:$0xff] (%p98_p4)  ;;  %s291_s27 = sshll.u32 (%p98_p4), %s658_s26, 4  ;;  %s551_s28 = scalar_lea.vmem (%p98_p4), %s302_s2, 128  ;;  %s292_s27 = int_to_ptr.vmem [resolvable:$true] %s291_s27 }
  0x7e   :  { %413 = vmatprep.subr.bf16.mxu1 (%p98_p4), %v654_v3  ;;  %406 = vmatpush3.bf16.msra.mxu0 (%p98_p4), %v405_v12  ;;  %v364_v17 = vld [vmem:[%s827_s5] ss:$0 sm:$0xff] (%p98_p4)  ;;  %p552_p5 = scmp.ne.s32.totalorder (%p98_p4), %s302_s2, %s551_s28  ;;  %p556_p6 = scmp.lt.s32.totalorder (%p98_p4), %s302_s2, %s302_s2 }
  0x7f   :  { %407 = vmatprep.subr.bf16.mxu0 (%p98_p4), %v654_v3  ;;  %p557_p7 = scmp.lt.s32.totalorder (%p98_p4), %s551_s28, %s551_s28 }
  0x81   :  { %415 = vmatpush3.bf16.msra.mxu1 (%p98_p4), %v414_v11  ;;  %p558_p8 = por (%p98_p4), %p557_p7, %p556_p6 }
  0x82   :  { %409 = vmatpush3.bf16.msra.mxu0 %v408_v13 }
  0x83   :  { %p559_p9 = pnand %p558_p8, %p552_p5 }
  0x84   :  { %402 = vmatmul.mubr.msk.f32.vlgmr.msra.gmra.mrb[0].mxu1 %vm120_vm1, %v194_v14 }
  0x85   :  { %391 = vmatmul.mubr.msk.f32.vlgmr.msra.gmra.mrb[0].mxu0 %vm120_vm1, %v108_v15 }
 0x157   :  { %v268_v16 = vpop.f32.mrb[0].mxu1 }
 0x158   :  { %v274_v18 = vmul.f32 0.3926991, %v268_v16  ;;  %273 = vst [vmem:[#allocation13] sm:$0xff] %v268_v16  ;;  %v403_v19 = vpop.f32.mrb[1].mxu1  ;;  %v190_v20 = vpop.f32.mrb[0].mxu0 }
 0x159   :  { %562 = shalt.err (!%p559_p9)
}
 0x15a   :  { %s563_s9 = scalar_lea.hbm %s829_s7, 128 }
 0x15b   :  { %p564_p10 = scmp.ne.s32.totalorder %s829_s7, %s563_s9  ;;  %p567_p11 = scmp.lt.u32.totalorder %s563_s9, %s829_s7 }
 0x15d   :  { %p569_p12 = pnand %p567_p11, %p564_p10 }
 0x15f   :  { %572 = shalt.err (!%p569_p12)
}
 0x160   :  { %304 = dma.vmem_to_hbm [thread:$0]  %s302_s2, 128, %s829_s7, [#allocation14]   ;;  %v275_v21 = vadd.f32 1.0, %v274_v18  ;;  %v191_v22 = vadd.f32 %v364_v17, %v190_v20  ;;  %v392_v23 = vpop.f32.mrb[1].mxu0 }
 0x161   :  { %s573_s15 = scalar_lea.vmem %s292_s27, 128  ;;  %p578_p0 = scmp.lt.s32.totalorder %s292_s27, %s292_s27 }
 0x162   :  { %443 = vrsqrt.f32 %v275_v21  ;;  %272 = vst [vmem:[#allocation12] sm:$0xff] %v191_v22  ;;  %p574_p13 = scmp.ne.s32.totalorder %s292_s27, %s573_s15  ;;  %p579_p1 = scmp.lt.s32.totalorder %s573_s15, %s573_s15 }
 0x164   :  { %p580_p2 = por %p579_p1, %p578_p0 }
 0x166   :  { %p581_p3 = pnand %p580_p2, %p574_p13 }
 0x168   :  { %584 = shalt.err (!%p581_p3)
}
 0x169   :  { %s585_s18 = scalar_lea.hbm %s828_s6, 128 }
 0x16a   :  { %p586_p4 = scmp.ne.s32.totalorder %s828_s6, %s585_s18  ;;  %p589_p5 = scmp.lt.u32.totalorder %s585_s18, %s828_s6 }
 0x16c   :  { %p591_p6 = pnand %p589_p5, %p586_p4 }
 0x16e   :  { %594 = shalt.err (!%p591_p6)
}
 0x16f   :  { %294 = dma.vmem_to_hbm [thread:$0]  %s292_s27, 128, %s828_s6, [#allocation9]   ;;  %v444_v24 = vpop.eup %443 }
 0x170   :  { %v277_v25 = vmul.f32 %v444_v24, %v191_v22  ;;  %s659_s23 = smov [#allocation15]  }
 0x171   :  { %s311_s24 = sshll.u32 %s659_s23, 4  ;;  %s312_s24 = int_to_ptr.vmem [resolvable:$true] %s311_s24 }
 0x172   :  { %v367_v26 = vmul.f32 -1.442695, %v277_v25  ;;  %s595_s25 = scalar_lea.vmem %s312_s24, 128  ;;  %p600_p8 = scmp.lt.s32.totalorder %s312_s24, %s312_s24 }
 0x173   :  { %p596_p7 = scmp.ne.s32.totalorder %s312_s24, %s595_s25  ;;  %p601_p9 = scmp.lt.s32.totalorder %s595_s25, %s595_s25 }
 0x174   :  { %445 = vpow2.f32 %v367_v26 }
 0x175   :  { %p602_p10 = por %p601_p9, %p600_p8 }
 0x177   :  { %p603_p11 = pnand %p602_p10, %p596_p7 }
 0x17e   :  { %v446_v27 = vpop.eup %445 }
 0x17f   :  { %v281_v28 = vadd.f32 1.0, %v446_v27 }
 0x181   :  { %447 = vrcp.f32 %v281_v28 }
 0x18b   :  { %v448_v29 = vpop.eup %447 }
 0x18c   :  { %284 = vst [vmem:[#allocation15] sm:$0xff] %v448_v29 }
 0x18d   :  { %606 = shalt.err (!%p603_p11)
}
 0x18e   :  { %s607_s2 = scalar_lea.hbm %s830_s8, 128 }
 0x18f   :  { %p608_p12 = scmp.ne.s32.totalorder %s830_s8, %s607_s2  ;;  %p611_p13 = scmp.lt.u32.totalorder %s607_s2, %s830_s8 }
 0x191   :  { %p613_p0 = pnand %p611_p13, %p608_p12 }
 0x193   :  { %616 = shalt.err (!%p613_p0)
}
 0x194   :  { %314 = dma.vmem_to_hbm [thread:$0]  %s312_s24, 128, %s830_s8, [#allocation14]  }
 0x195   :  { %635 = dma.done.wait [#allocation9], 128  }
 0x196   :  { %636 = vsyncadd [#allocation9], 4294967168 }
 0x197   :  { %637 = dma.done.wait [#allocation14], 256  }
 0x198   :  { %638 = vsyncadd [#allocation14], 4294967040 }
 0x199   :  { %324 = vsyncpa [#allocation8], 1 }
 0x19a   :  { %325 = vsyncpa [#allocation11], 1 }
 0x19b   :  { %326 = vsyncpa [#allocation9], 1 }
 0x19c   :  { %327 = vsyncpa [#allocation14], 1 }
 0x19d   :  { %328 = vsyncmov [#allocation4] }
 0x1a0   :  { %s329_s30 = vpop.sfrf %328 }
 0x1a1   :  { %p368_p1 = scmp.ne.s32.totalorder %s329_s30, 0 }
 0x1a3   :  { %333 = shalt.err (%p368_p1)  }
 0x1a4   :  { %335 = vsyncmov [#allocation4 + $0x1] }
 0x1a7   :  { %s336_s9 = vpop.sfrf %335 }
 0x1a8   :  { %p369_p2 = scmp.ne.s32.totalorder %s336_s9, 0 }
 0x1aa   :  { %340 = shalt.err (%p369_p2)  }

</bundles_post_ra>
